<compile_context>
chip_gen: v6e
topology: v6e:2x2x1
jax: 0.10.0
libtpu: 0.0.40
codegen_flags: <defaults>
</compile_context>

<pallas_src>
import functools

import jax
import jax.numpy as jnp
from jax.experimental import pallas as pl
from jax.experimental.pallas import tpu as pltpu


def _scaled_shifted_sigmoid_kernel(x_ref, o_ref, *, half_scale, half_inv_scale, offset):
    # scale*sigmoid(x/scale) + low
    #   = scale*(0.5*tanh(x/(2*scale)) + 0.5) + low
    #   = half_scale * tanh(x * half_inv_scale) + offset
    x = x_ref[...].astype(jnp.float32)
    t = jnp.tanh(x * half_inv_scale)            # single EUP transcendental per vreg
    o_ref[...] = (t * half_scale + offset).astype(o_ref.dtype)


def _round_up(a, b):
    return ((a + b - 1) // b) * b


def _has_two_tensorcores():
    # v7x has 2 TensorCores per chip; v5e / v6e have 1.
    try:
        kind = jax.devices()[0].device_kind.lower()
    except Exception:
        return False
    return "v7" in kind


def _fast_path(x, half_scale, half_inv_scale, offset):
    xf = x.astype(jnp.float32)
    return (half_scale * jnp.tanh(xf * half_inv_scale) + offset).astype(x.dtype)


def _choose_row_tile(rows, cols, sublane, multi_tc):
    """Pick (row_tile, grid) for a (rows, cols) lane-dense slab."""
    if rows <= sublane:
        return rows, 1                          # full-dim block (allowed by layout rule)

    # ~1M elements per block: 4 MiB f32 / 2 MiB bf16. Amortizes the ~0.35us
    # per-grid-step overhead; double-buffered in+out stays <= 16 MiB.
    target_elems = 1 << 20
    tr = max(sublane, (target_elems // cols) // sublane * sublane)
    tr = min(tr, _round_up(rows, sublane))
    grid = pl.cdiv(rows, tr)

    if multi_tc:
        if grid == 1 and rows >= 2 * sublane:
            # Give the second TensorCore something to do.
            tr = max(sublane, _round_up(pl.cdiv(rows, 2), sublane))
            grid = pl.cdiv(rows, tr)
        elif 1 < grid <= 8 and grid % 2 == 1:
            # Rebalance a small odd grid to an even block count (avoid a
            # one-block imbalance between the two TCs).
            tr_even = max(sublane, _round_up(pl.cdiv(rows, grid + 1), sublane))
            if pl.cdiv(rows, tr_even) % 2 == 0:
                tr = tr_even
                grid = pl.cdiv(rows, tr)
    return tr, grid


def _pallas_apply_2d(x2d, kernel, out_dtype, n_logical, itemsize, sublane,
                     multi_tc, alias_input):
    rows, cols = x2d.shape
    tr, grid = _choose_row_tile(rows, cols, sublane, multi_tc)
    extra = {"input_output_aliases": {0: 0}} if alias_input else {}
    return pl.pallas_call(
        kernel,
        out_shape=jax.ShapeDtypeStruct((rows, cols), out_dtype),
        grid_spec=pltpu.PrefetchScalarGridSpec(
            num_scalar_prefetch=0,
            grid=(grid,),
            in_specs=[pl.BlockSpec((tr, cols), lambda i: (i, 0))],
            out_specs=pl.BlockSpec((tr, cols), lambda i: (i, 0)),
        ),
        compiler_params=pltpu.CompilerParams(
            dimension_semantics=("parallel",),
            # Explicit override: v5e default scoped VMEM is 16 MiB; the 4 MiB
            # double-buffered in+out blocks (+ f32 upcast temps for bf16) need
            # the headroom. Do not raise past ~48 MiB (v7x has 64 MiB physical).
            vmem_limit_bytes=32 * 1024 * 1024,
        ),
        cost_estimate=pl.CostEstimate(
            flops=3 * n_logical,
            transcendentals=n_logical,
            bytes_accessed=2 * n_logical * itemsize,
        ),
        **extra,
    )(x2d)


def scaled_shifted_sigmoid(x, low=0.0, high=1.0, *,
                           min_pallas_elems=64 * 1024, alias_input=False):
    """Applies scale*sigmoid(x/scale)+low elementwise; x is any shape (e.g. NCHW).

    min_pallas_elems: below this size, compute in plain JAX (fixed pallas_call
                      overhead dominates and XLA fuses the expression anyway).
    alias_input:      reuse the input HBM buffer for the output; only enable
                      when the caller donates x at a jit boundary.
    """
    scale = float(high) - float(low)
    if scale == 0.0:
        raise ValueError("ScaledShiftedSigmoid requires high != low (scale != 0).")
    if not jnp.issubdtype(x.dtype, jnp.floating):
        raise TypeError("ScaledShiftedSigmoid expects a floating-point input.")

    half_scale = 0.5 * scale
    half_inv_scale = 0.5 / scale
    offset = 0.5 * scale + float(low)

    orig_shape = x.shape
    orig_dtype = x.dtype
    n = x.size

    # Small-input fast path: avoid pallas_call fixed overhead on tiny tensors.
    if n == 0 or n < max(min_pallas_elems, 128):
        return _fast_path(x, half_scale, half_inv_scale, offset)

    itemsize = jnp.dtype(orig_dtype).itemsize
    # sublane packing: 8 rows for 32-bit, 16 for 16-bit, 32 for 8-bit dtypes
    sublane = max(8, 32 // itemsize)
    multi_tc = _has_two_tensorcores()

    kernel = functools.partial(
        _scaled_shifted_sigmoid_kernel,
        half_scale=half_scale,
        half_inv_scale=half_inv_scale,
        offset=offset,
    )

    if n % 128 == 0:
        # Pad-free path: lane-dense reshape in place, Pallas masks any ragged
        # last row-block itself. cols stays a multiple of 128 -> unmasked vst.
        cols = 128
        for c in (1024, 512, 256):
            if n % c == 0:
                cols = c
                break
        rows = n // cols
        x2d = x.reshape(rows, cols)
        out2d = _pallas_apply_2d(x2d, kernel, orig_dtype, n, itemsize, sublane,
                                 multi_tc, alias_input)
        return out2d.reshape(orig_shape)

    # Fallback for n % 128 != 0: pad the flat tail up to a whole 1024-lane row.
    # This costs up to two extra HBM passes (pad + trailing slice), but only
    # fires for lane-misaligned sizes.
    cols = 1024
    rows = pl.cdiv(n, cols)
    total = rows * cols
    xf = jnp.pad(x.reshape(-1), (0, total - n))
    x2d = xf.reshape(rows, cols)
    out2d = _pallas_apply_2d(x2d, kernel, orig_dtype, n, itemsize, sublane,
                             multi_tc, alias_input)
    return out2d.reshape(-1)[:n].reshape(orig_shape)


# TODO(synk): right_inverse (logit) is not needed for the forward pass and is
# not implemented as a Pallas kernel.


if __name__ == "__main__":
    # Module "parameters" (constructor args) — deterministic, in-script.
    LOW, HIGH = 0.25, 1.75  # scale = 1.5

    key = jax.random.PRNGKey(0)
    x = jax.random.normal(key, (2, 4, 16, 16), dtype=jnp.float32)  # NCHW

    # Force the Pallas path (the demo tensor is small enough that the default
    # threshold would take the fused plain-JAX fast path).
    out = scaled_shifted_sigmoid(x, low=LOW, high=HIGH, min_pallas_elems=0)
    out = jax.block_until_ready(out)

    # Reference check in plain JAX (exact module semantics).
    scale = HIGH - LOW
    ref = scale * jax.nn.sigmoid(x / scale) + LOW
    assert out.shape == x.shape and out.dtype == x.dtype
    assert jnp.allclose(out, ref, atol=1e-5, rtol=1e-5)

    # Also sanity-check the small-input fast path (default threshold).
    out_fast = jax.block_until_ready(scaled_shifted_sigmoid(x, low=LOW, high=HIGH))
    assert jnp.allclose(out_fast, ref, atol=1e-5, rtol=1e-5)

    print("KERNEL_OK")
</pallas_src>

<mosaic_0001>
module attributes {stable_mosaic.version = 11 : i64} {
  func.func @_scaled_shifted_sigmoid_kernel(%arg0: i32, %arg1: memref<2x1024xf32, #tpu.memory_space<vmem>>, %arg2: memref<2x1024xf32, #tpu.memory_space<vmem>>) attributes {dimension_semantics = [#tpu.dimension_semantics<parallel>], iteration_bounds = array<i64: 1>, scalar_prefetch = 0 : i64, scratch_operands = 0 : i64, tpu.core_type = #tpu.core_type<tc>, window_params = [{transform_indices = @transform_0, window_bounds = array<i64: 2, 1024>}, {transform_indices = @transform_1, window_bounds = array<i64: 2, 1024>}]} {
    %c0 = arith.constant 0 : index
    %c0_0 = arith.constant 0 : index
    %0 = vector.load %arg1[%c0, %c0_0] : memref<2x1024xf32, #tpu.memory_space<vmem>>, vector<2x1024xf32>
    %cst = arith.constant 0.333333343 : f32
    %1 = vector.broadcast %cst : f32 to vector<2x1024xf32>
    %2 = arith.mulf %0, %1 : vector<2x1024xf32>
    %3 = math.tanh %2 : vector<2x1024xf32>
    %cst_1 = arith.constant 7.500000e-01 : f32
    %4 = vector.broadcast %cst_1 : f32 to vector<2x1024xf32>
    %5 = arith.mulf %3, %4 : vector<2x1024xf32>
    %cst_2 = arith.constant 1.000000e+00 : f32
    %6 = vector.broadcast %cst_2 : f32 to vector<2x1024xf32>
    %7 = arith.addf %5, %6 : vector<2x1024xf32>
    %c0_3 = arith.constant 0 : index
    %c0_4 = arith.constant 0 : index
    %8 = vector.load %arg2[%c0_3, %c0_4] : memref<2x1024xf32, #tpu.memory_space<vmem>>, vector<2x1024xf32>
    tpu.vector_store %arg2[%c0_3, %c0_4], %7 {strides = array<i32>} : memref<2x1024xf32, #tpu.memory_space<vmem>>, vector<2x1024xf32>,
    return
  }
  func.func @transform_0(%arg0: i32) -> (i32, i32) {
    %c0_i32 = arith.constant 0 : i32
    %c0_i32_0 = arith.constant 0 : i32
    return %arg0, %c0_i32 : i32, i32
  }
  func.func @transform_1(%arg0: i32) -> (i32, i32) {
    %c0_i32 = arith.constant 0 : i32
    %c0_i32_0 = arith.constant 0 : i32
    return %arg0, %c0_i32 : i32, i32
  }
}

</mosaic_0001>

<bundles_post_ra>
// kernel: tpu_custom_call.1
= control target key start
LH: loop header
LB: loop body
LE: loop exit
PB: predicated region body
PF: predicated region fallthrough
CT: control target
= control target key end

     0   :  { %6 = vsyncpa [#allocation3], 0  ;;  %s116_s0 = inlined_call_operand.hbm [shape: f32[2,1024], index: 0, kind: input, shape index: {}]   ;;  %s117_s1 = inlined_call_operand.hbm [shape: f32[2,1024], index: 1, kind: output, shape index: {}]  }
   0x1   :  { %7 = vsyncpa [#allocation4], 0  ;;  %s98_s6 = smov [#allocation2]  }
   0x2   :  { %s14_s7 = sshll.u32 %s98_s6, 4  ;;  %s15_s7 = int_to_ptr.vmem [resolvable:$true] %s14_s7 }
   0x3   :  { %s62_s8 = scalar_lea.vmem %s15_s7, 256  ;;  %p67_p1 = scmp.lt.s32.totalorder %s15_s7, %s15_s7 }
   0x4   :  { %p63_p0 = scmp.ne.s32.totalorder %s15_s7, %s62_s8  ;;  %p68_p2 = scmp.lt.s32.totalorder %s62_s8, %s62_s8 }
   0x6   :  { %p69_p3 = por %p68_p2, %p67_p1 }
   0x8   :  { %p70_p4 = pnand %p69_p3, %p63_p0 }
   0xa   :  { %73 = shalt.err (!%p70_p4)
}
   0xb   :  { %17 = dma.hbm_to_vmem [thread:$0]  %s116_s0, 256, %s15_s7, [#allocation3]  }
   0xc   :  { %94 = dma.done.wait [#allocation3], 256  }
   0xd   :  { %95 = vsyncadd [#allocation3], 4294967040  ;;  %v21_v0 = vld [vmem:[#allocation2] sm:$0xff]  ;;  %v22_v1 = vld [vmem:[#allocation2 + $0x8] sm:$0xff]  ;;  %s99_s11 = smov [#allocation5]  }
   0xe   :  { %v23_v2 = vmul.f32 0.33333334, %v21_v0  ;;  %v24_v3 = vmul.f32 0.33333334, %v22_v1  ;;  %s39_s12 = sshll.u32 %s99_s11, 4  ;;  %s40_s12 = int_to_ptr.vmem [resolvable:$true] %s39_s12 }
   0xf   :  { %s74_s0 = scalar_lea.vmem %s40_s12, 256  ;;  %p79_p6 = scmp.lt.s32.totalorder %s40_s12, %s40_s12 }
  0x10   :  { %50 = vtanh.f32 %v23_v2  ;;  %p75_p5 = scmp.ne.s32.totalorder %s40_s12, %s74_s0  ;;  %p80_p7 = scmp.lt.s32.totalorder %s74_s0, %s74_s0 }
  0x11   :  { %52 = vtanh.f32 %v24_v3 }
  0x12   :  { %p81_p8 = por %p80_p7, %p79_p6 }
  0x14   :  { %p82_p9 = pnand %p81_p8, %p75_p5 }
  0x1d   :  { %v51_v4 = vpop.eup %50 }
  0x1e   :  { %v53_v5 = vpop.eup %52  ;;  %v27_v6 = vmul.f32 0.75, %v51_v4 }
  0x1f   :  { %v28_v7 = vmul.f32 0.75, %v53_v5 }
  0x20   :  { %v29_v8 = vadd.f32 1.0, %v27_v6 }
  0x21   :  { %v30_v9 = vadd.f32 1.0, %v28_v7 }
  0x22   :  { %31 = vst [vmem:[#allocation5] sm:$0xff] %v29_v8 }
  0x23   :  { %32 = vst [vmem:[#allocation5 + $0x8] sm:$0xff] %v30_v9 }
  0x24   :  { %85 = shalt.err (!%p82_p9)
}
  0x25   :  { %42 = dma.vmem_to_hbm [thread:$0]  %s40_s12, 256, %s117_s1, [#allocation4]  }
  0x26   :  { %96 = dma.done.wait [#allocation4], 256  }
  0x27   :  { %97 = vsyncadd [#allocation4], 4294967040 }
  0x28   :  { %46 = vsyncpa [#allocation3], 1 }
  0x29   :  { %47 = vsyncpa [#allocation4], 1 }

</bundles_post_ra>
